<compile_context>
chip_gen: v7x
topology: tpu7x:2x2x1
jax: 0.10.0
libtpu: 0.0.40
codegen_flags: <defaults>
</compile_context>

<pallas_src>
import jax
import jax.numpy as jnp
from jax.experimental import pallas as pl
from jax.experimental.pallas import tpu as pltpu

_SUBLANES = 8
_LANES = 128


def _round_up(x, m):
    return ((x + m - 1) // m) * m


def _make_truncate_kernel(add_bos, add_eos, bos_idx, eos_idx, out_len):
    """All flags / lengths are baked in statically (module config + static L)."""

    def kernel(tok_ref, st_ref, en_ref, tok_o, st_o, en_o):
        lane = None
        if add_bos or add_eos:
            # One lane-index map, reused by all three streams (VPU only).
            lane = jax.lax.broadcasted_iota(jnp.int32, tok_ref.shape, 1)

        def _process(x, head, tail):
            # The wrapper already placed the kept tokens at lanes
            # [add_bos, add_bos + trunc_len) and zero-filled all other lanes,
            # so only the BOS / EOS lanes need patching; lanes >= out_len are
            # guaranteed zero and are sliced away by the wrapper.
            if add_bos:
                x = jnp.where(lane < add_bos, jnp.int32(head), x)
            if add_eos:
                x = jnp.where(lane == out_len - 1, jnp.int32(tail), x)
            return x

        tok_o[...] = _process(tok_ref[...], bos_idx, eos_idx)
        st_o[...] = _process(st_ref[...], -1, -1)
        en_o[...] = _process(en_ref[...], -1, -1)

    return kernel


def truncate_transform_batch(token_ids, start_ids, end_ids, *,
                             bos_idx=-1, eos_idx=-1, max_seq_len=256):
    """Batched TruncateTransform: (B, L) int arrays -> (B, out_len) arrays."""
    token_ids = jnp.asarray(token_ids, jnp.int32)
    start_ids = jnp.asarray(start_ids, jnp.int32)
    end_ids = jnp.asarray(end_ids, jnp.int32)
    B, L = token_ids.shape
    assert start_ids.shape == (B, L) and end_ids.shape == (B, L)

    add_bos = 1 if bos_idx >= 0 else 0
    add_eos = 1 if eos_idx >= 0 else 0
    if max_seq_len < add_bos + add_eos:
        raise ValueError("max_seq_len must leave room for the BOS/EOS tokens")
    inner_max = max_seq_len - add_bos - add_eos
    trunc_len = min(L, inner_max)
    out_len = trunc_len + add_bos + add_eos

    # Lane-dense tile sized to the *output* width, never the raw input length.
    Wp = max(_round_up(out_len, _LANES), _LANES)
    b_tile = _SUBLANES
    Bp = _round_up(max(B, 1), b_tile)

    def _prep(x):
        # Drop the truncated tail first (so the pad copy is bounded by
        # max_seq_len, not L), then front-pad `add_bos` zero lanes (this IS
        # the BOS shift), pad lanes to Wp and rows to the sublane tile.
        x = x[:, :trunc_len]
        return jnp.pad(x, ((0, Bp - B), (add_bos, Wp - trunc_len - add_bos)))

    ins = (_prep(token_ids), _prep(start_ids), _prep(end_ids))

    kernel = _make_truncate_kernel(add_bos, add_eos, bos_idx, eos_idx, out_len)
    spec = pl.BlockSpec((b_tile, Wp), lambda i: (i, 0))
    out_sds = jax.ShapeDtypeStruct((Bp, Wp), jnp.int32)

    tok, st, en = pl.pallas_call(
        kernel,
        grid=(Bp // b_tile,),
        in_specs=[spec, spec, spec],
        out_specs=(spec, spec, spec),
        out_shape=(out_sds, out_sds, out_sds),
        compiler_params=pltpu.CompilerParams(
            dimension_semantics=("parallel",)),
    )(*ins)

    return tok[:B, :out_len], st[:B, :out_len], en[:B, :out_len]


def truncate_transform(tokens, *, bos_idx=-1, eos_idx=-1, max_seq_len=256):
    """Per-sequence dict API matching TruncateTransform.forward."""
    tok, st, en = truncate_transform_batch(
        jnp.asarray(tokens["token_ids"], jnp.int32)[None, :],
        jnp.asarray(tokens["start_ids"], jnp.int32)[None, :],
        jnp.asarray(tokens["end_ids"], jnp.int32)[None, :],
        bos_idx=bos_idx, eos_idx=eos_idx, max_seq_len=max_seq_len)
    return {"token_ids": tok[0], "start_ids": st[0], "end_ids": en[0]}


# ----------------------------- reference / tests -----------------------------

def _reference_seq(token_ids, start_ids, end_ids, bos_idx, eos_idx, max_seq_len):
    """Pure-JAX reference mirroring the PyTorch semantics (one sequence)."""
    add_bos = 1 if bos_idx >= 0 else 0
    add_eos = 1 if eos_idx >= 0 else 0
    inner_max = max_seq_len - add_bos - add_eos

    def build(x, head, tail):
        parts = []
        if add_bos:
            parts.append(jnp.array([head], jnp.int32))
        parts.append(x[:inner_max].astype(jnp.int32))
        if add_eos:
            parts.append(jnp.array([tail], jnp.int32))
        return jnp.concatenate(parts)

    return {"token_ids": build(token_ids, bos_idx, eos_idx),
            "start_ids": build(start_ids, -1, -1),
            "end_ids": build(end_ids, -1, -1)}


def _check_seq(tokens, bos_idx, eos_idx, max_seq_len):
    out = truncate_transform(tokens, bos_idx=bos_idx, eos_idx=eos_idx,
                             max_seq_len=max_seq_len)
    jax.block_until_ready(out)
    ref = _reference_seq(tokens["token_ids"], tokens["start_ids"],
                         tokens["end_ids"], bos_idx, eos_idx, max_seq_len)
    for k in ("token_ids", "start_ids", "end_ids"):
        assert out[k].shape == ref[k].shape, (k, out[k].shape, ref[k].shape)
        assert bool(jnp.all(out[k] == ref[k])), k


def _check_batch(tok, st, en, bos_idx, eos_idx, max_seq_len):
    o_tok, o_st, o_en = truncate_transform_batch(
        tok, st, en, bos_idx=bos_idx, eos_idx=eos_idx, max_seq_len=max_seq_len)
    jax.block_until_ready((o_tok, o_st, o_en))
    for b in range(tok.shape[0]):
        ref = _reference_seq(tok[b], st[b], en[b], bos_idx, eos_idx, max_seq_len)
        for name, got in (("token_ids", o_tok[b]), ("start_ids", o_st[b]),
                          ("end_ids", o_en[b])):
            assert got.shape == ref[name].shape, (name, got.shape, ref[name].shape)
            assert bool(jnp.all(got == ref[name])), (name, b)


if __name__ == "__main__":
    key = jax.random.PRNGKey(0)
    k1, k2 = jax.random.split(key)

    # Case 1: small single sequence; truncation + BOS + EOS all trigger.
    L = 8
    token_ids = jax.random.randint(k1, (L,), 3, 100, dtype=jnp.int32)
    start_ids = jnp.arange(L, dtype=jnp.int32) * 2
    end_ids = start_ids + 1
    toks = {"token_ids": token_ids, "start_ids": start_ids, "end_ids": end_ids}
    _check_seq(toks, bos_idx=0, eos_idx=2, max_seq_len=8)

    # Case 2: no BOS / no EOS, pure truncation.
    _check_seq(toks, bos_idx=-1, eos_idx=-1, max_seq_len=4)

    # Case 3: batched sequences longer than max_seq_len (tile sized to out_len,
    # not L), lanes spanning multiple vregs.
    B, L3 = 5, 300
    tok3 = jax.random.randint(k2, (B, L3), 3, 100, dtype=jnp.int32)
    st3 = jnp.tile(jnp.arange(L3, dtype=jnp.int32)[None, :] * 2, (B, 1))
    en3 = st3 + 1
    _check_batch(tok3, st3, en3, bos_idx=1, eos_idx=2, max_seq_len=256)

    print("KERNEL_OK")
</pallas_src>

<mosaic_0001>
module attributes {stable_mosaic.version = 11 : i64} {
  func.func @kernel(%arg0: i32, %arg1: memref<8x128xi32, #tpu.memory_space<vmem>>, %arg2: memref<8x128xi32, #tpu.memory_space<vmem>>, %arg3: memref<8x128xi32, #tpu.memory_space<vmem>>, %arg4: memref<8x128xi32, #tpu.memory_space<vmem>>, %arg5: memref<8x128xi32, #tpu.memory_space<vmem>>, %arg6: memref<8x128xi32, #tpu.memory_space<vmem>>) attributes {dimension_semantics = [#tpu.dimension_semantics<parallel>], iteration_bounds = array<i64: 1>, scalar_prefetch = 0 : i64, scratch_operands = 0 : i64, tpu.core_type = #tpu.core_type<tc>, window_params = [{transform_indices = @transform_0, window_bounds = array<i64: 8, 128>}, {transform_indices = @transform_1, window_bounds = array<i64: 8, 128>}, {transform_indices = @transform_2, window_bounds = array<i64: 8, 128>}, {transform_indices = @transform_3, window_bounds = array<i64: 8, 128>}, {transform_indices = @transform_4, window_bounds = array<i64: 8, 128>}, {transform_indices = @transform_5, window_bounds = array<i64: 8, 128>}]} {
    %0 = tpu.iota {dimensions = array<i32: 1>} : vector<8x128xi32>
    %c0 = arith.constant 0 : index
    %c0_0 = arith.constant 0 : index
    %1 = vector.load %arg1[%c0, %c0_0] : memref<8x128xi32, #tpu.memory_space<vmem>>, vector<8x128xi32>
    %c1_i32 = arith.constant 1 : i32
    %2 = vector.broadcast %c1_i32 : i32 to vector<8x128xi32>
    %3 = arith.cmpi slt, %0, %2 : vector<8x128xi32>
    %c0_i32 = arith.constant 0 : i32
    %4 = vector.broadcast %c0_i32 : i32 to vector<8x128xi32>
    %5 = arith.select %3, %4, %1 : vector<8x128xi1>, vector<8x128xi32>
    %c7_i32 = arith.constant 7 : i32
    %6 = vector.broadcast %c7_i32 : i32 to vector<8x128xi32>
    %7 = arith.cmpi eq, %0, %6 : vector<8x128xi32>
    %c2_i32 = arith.constant 2 : i32
    %8 = vector.broadcast %c2_i32 : i32 to vector<8x128xi32>
    %9 = arith.select %7, %8, %5 : vector<8x128xi1>, vector<8x128xi32>
    %c0_1 = arith.constant 0 : index
    %c0_2 = arith.constant 0 : index
    %10 = vector.load %arg4[%c0_1, %c0_2] : memref<8x128xi32, #tpu.memory_space<vmem>>, vector<8x128xi32>
    tpu.vector_store %arg4[%c0_1, %c0_2], %9 {strides = array<i32>} : memref<8x128xi32, #tpu.memory_space<vmem>>, vector<8x128xi32>,
    %c0_3 = arith.constant 0 : index
    %c0_4 = arith.constant 0 : index
    %11 = vector.load %arg2[%c0_3, %c0_4] : memref<8x128xi32, #tpu.memory_space<vmem>>, vector<8x128xi32>
    %c1_i32_5 = arith.constant 1 : i32
    %12 = vector.broadcast %c1_i32_5 : i32 to vector<8x128xi32>
    %13 = arith.cmpi slt, %0, %12 : vector<8x128xi32>
    %c-1_i32 = arith.constant -1 : i32
    %14 = vector.broadcast %c-1_i32 : i32 to vector<8x128xi32>
    %15 = arith.select %13, %14, %11 : vector<8x128xi1>, vector<8x128xi32>
    %c7_i32_6 = arith.constant 7 : i32
    %16 = vector.broadcast %c7_i32_6 : i32 to vector<8x128xi32>
    %17 = arith.cmpi eq, %0, %16 : vector<8x128xi32>
    %c-1_i32_7 = arith.constant -1 : i32
    %18 = vector.broadcast %c-1_i32_7 : i32 to vector<8x128xi32>
    %19 = arith.select %17, %18, %15 : vector<8x128xi1>, vector<8x128xi32>
    %c0_8 = arith.constant 0 : index
    %c0_9 = arith.constant 0 : index
    %20 = vector.load %arg5[%c0_8, %c0_9] : memref<8x128xi32, #tpu.memory_space<vmem>>, vector<8x128xi32>
    tpu.vector_store %arg5[%c0_8, %c0_9], %19 {strides = array<i32>} : memref<8x128xi32, #tpu.memory_space<vmem>>, vector<8x128xi32>,
    %c0_10 = arith.constant 0 : index
    %c0_11 = arith.constant 0 : index
    %21 = vector.load %arg3[%c0_10, %c0_11] : memref<8x128xi32, #tpu.memory_space<vmem>>, vector<8x128xi32>
    %c1_i32_12 = arith.constant 1 : i32
    %22 = vector.broadcast %c1_i32_12 : i32 to vector<8x128xi32>
    %23 = arith.cmpi slt, %0, %22 : vector<8x128xi32>
    %c-1_i32_13 = arith.constant -1 : i32
    %24 = vector.broadcast %c-1_i32_13 : i32 to vector<8x128xi32>
    %25 = arith.select %23, %24, %21 : vector<8x128xi1>, vector<8x128xi32>
    %c7_i32_14 = arith.constant 7 : i32
    %26 = vector.broadcast %c7_i32_14 : i32 to vector<8x128xi32>
    %27 = arith.cmpi eq, %0, %26 : vector<8x128xi32>
    %c-1_i32_15 = arith.constant -1 : i32
    %28 = vector.broadcast %c-1_i32_15 : i32 to vector<8x128xi32>
    %29 = arith.select %27, %28, %25 : vector<8x128xi1>, vector<8x128xi32>
    %c0_16 = arith.constant 0 : index
    %c0_17 = arith.constant 0 : index
    %30 = vector.load %arg6[%c0_16, %c0_17] : memref<8x128xi32, #tpu.memory_space<vmem>>, vector<8x128xi32>
    tpu.vector_store %arg6[%c0_16, %c0_17], %29 {strides = array<i32>} : memref<8x128xi32, #tpu.memory_space<vmem>>, vector<8x128xi32>,
    return
  }
  func.func @transform_0(%arg0: i32) -> (i32, i32) {
    %c0_i32 = arith.constant 0 : i32
    %c0_i32_0 = arith.constant 0 : i32
    return %arg0, %c0_i32 : i32, i32
  }
  func.func @transform_1(%arg0: i32) -> (i32, i32) {
    %c0_i32 = arith.constant 0 : i32
    %c0_i32_0 = arith.constant 0 : i32
    return %arg0, %c0_i32 : i32, i32
  }
  func.func @transform_2(%arg0: i32) -> (i32, i32) {
    %c0_i32 = arith.constant 0 : i32
    %c0_i32_0 = arith.constant 0 : i32
    return %arg0, %c0_i32 : i32, i32
  }
  func.func @transform_3(%arg0: i32) -> (i32, i32) {
    %c0_i32 = arith.constant 0 : i32
    %c0_i32_0 = arith.constant 0 : i32
    return %arg0, %c0_i32 : i32, i32
  }
  func.func @transform_4(%arg0: i32) -> (i32, i32) {
    %c0_i32 = arith.constant 0 : i32
    %c0_i32_0 = arith.constant 0 : i32
    return %arg0, %c0_i32 : i32, i32
  }
  func.func @transform_5(%arg0: i32) -> (i32, i32) {
    %c0_i32 = arith.constant 0 : i32
    %c0_i32_0 = arith.constant 0 : i32
    return %arg0, %c0_i32 : i32, i32
  }
}

</mosaic_0001>

<bundles_post_ra>
// kernel: tpu_custom_call.1
= control target key start
LH: loop header
LB: loop body
LE: loop exit
PB: predicated region body
PF: predicated region fallthrough
CT: control target
= control target key end

     0   :  { %11 = vsyncpa [#allocation3], 0  ;;  %s381_s0 = inlined_call_operand.hbm [shape: s32[8,128], index: 0, kind: input, shape index: {}]   ;;  %s382_s1 = inlined_call_operand.hbm [shape: s32[8,128], index: 1, kind: input, shape index: {}]   ;;  %s383_s2 = inlined_call_operand.hbm [shape: s32[8,128], index: 2, kind: input, shape index: {}]   ;;  %s384_s3 = inlined_call_operand.hbm [shape: s32[8,128], index: 3, kind: output, shape index: {0}]   ;;  %s385_s4 = inlined_call_operand.hbm [shape: s32[8,128], index: 4, kind: output, shape index: {1}]   ;;  %s386_s5 = inlined_call_operand.hbm [shape: s32[8,128], index: 5, kind: output, shape index: {2}]  }
   0x1   :  { %12 = vsyncpa [#allocation6], 0 }
   0x2   :  { %13 = vsyncpa [#allocation4], 0 }
   0x3   :  { %14 = vsyncpa [#allocation10], 0  ;;  %s259_s18 = smov [#allocation5]   ;;  %s260_s20 = smov [#allocation2]  }
   0x4   :  { %s31_s19 = sshll.u32 %s259_s18, 4  ;;  %s21_s21 = sshll.u32 %s260_s20, 4  ;;  %s32_s19 = int_to_ptr.vmem [resolvable:$true] %s31_s19  ;;  %s22_s21 = int_to_ptr.vmem [resolvable:$true] %s21_s21 }
   0x5   :  { %s119_s24 = scalar_lea.hbm %s382_s1, 128 }
   0x6   :  { %p120_p0 = scmp.ne.s32.totalorder %s382_s1, %s119_s24  ;;  %p123_p1 = scmp.lt.u32.totalorder %s119_s24, %s382_s1 }
   0x8   :  { %p125_p2 = pnand %p123_p1, %p120_p0 }
   0xa   :  { %128 = shalt.err (!%p125_p2)
}
   0xb   :  { %s129_s29 = scalar_lea.vmem %s32_s19, 128  ;;  %p134_p4 = scmp.lt.s32.totalorder %s32_s19, %s32_s19 }
   0xc   :  { %p130_p3 = scmp.ne.s32.totalorder %s32_s19, %s129_s29  ;;  %p135_p5 = scmp.lt.s32.totalorder %s129_s29, %s129_s29 }
   0xe   :  { %p136_p6 = por %p135_p5, %p134_p4 }
  0x10   :  { %p137_p7 = pnand %p136_p6, %p130_p3 }
  0x12   :  { %140 = shalt.err (!%p137_p7)
}
  0x13   :  { %34 = dma.hbm_to_vmem [thread:$0]  %s382_s1, 128, %s32_s19, [#allocation6]  }
  0x14   :  { %s141_s9 = scalar_lea.hbm %s381_s0, 128 }
  0x15   :  { %p142_p8 = scmp.ne.s32.totalorder %s381_s0, %s141_s9  ;;  %p145_p9 = scmp.lt.u32.totalorder %s141_s9, %s381_s0 }
  0x17   :  { %p147_p10 = pnand %p145_p9, %p142_p8 }
  0x19   :  { %150 = shalt.err (!%p147_p10)
}
  0x1a   :  { %s151_s14 = scalar_lea.vmem %s22_s21, 128  ;;  %p156_p12 = scmp.lt.s32.totalorder %s22_s21, %s22_s21 }
  0x1b   :  { %p152_p11 = scmp.ne.s32.totalorder %s22_s21, %s151_s14  ;;  %p157_p13 = scmp.lt.s32.totalorder %s151_s14, %s151_s14 }
  0x1d   :  { %p158_p0 = por %p157_p13, %p156_p12 }
  0x1f   :  { %p159_p1 = pnand %p158_p0, %p152_p11 }
  0x21   :  { %162 = shalt.err (!%p159_p1)
}
  0x22   :  { %24 = dma.hbm_to_vmem [thread:$0]  %s381_s0, 128, %s22_s21, [#allocation3]  }
  0x23   :  { %s261_s16 = smov [#allocation7]   ;;  %s163_s20 = scalar_lea.hbm %s383_s2, 128 }
  0x24   :  { %s41_s17 = sshll.u32 %s261_s16, 4  ;;  %p164_p2 = scmp.ne.s32.totalorder %s383_s2, %s163_s20  ;;  %s42_s17 = int_to_ptr.vmem [resolvable:$true] %s41_s17 }
  0x25   :  { %p167_p3 = scmp.lt.u32.totalorder %s163_s20, %s383_s2 }
  0x27   :  { %p169_p4 = pnand %p167_p3, %p164_p2 }
  0x29   :  { %172 = shalt.err (!%p169_p4)
}
  0x2a   :  { %s173_s26 = scalar_lea.vmem %s42_s17, 128  ;;  %p178_p6 = scmp.lt.s32.totalorder %s42_s17, %s42_s17 }
  0x2b   :  { %p174_p5 = scmp.ne.s32.totalorder %s42_s17, %s173_s26  ;;  %p179_p7 = scmp.lt.s32.totalorder %s173_s26, %s173_s26 }
  0x2d   :  { %p180_p8 = por %p179_p7, %p178_p6 }
  0x2f   :  { %p181_p9 = pnand %p180_p8, %p174_p5 }
  0x31   :  { %184 = shalt.err (!%p181_p9)
}
  0x32   :  { %44 = dma.hbm_to_vmem [thread:$0]  %s383_s2, 128, %s42_s17, [#allocation6]  }
  0x33   :  { %251 = dma.done.wait [#allocation3], 128  }
  0x34   :  { %252 = vsyncadd [#allocation3], 4294967168 }
  0x35   :  { %253 = dma.done.wait [#allocation6], 256  }
  0x36   :  { %254 = vsyncadd [#allocation6], 4294967040  ;;  %v54_v0 = vlaneseq  ;;  %s262_s27 = smov [#allocation9]   ;;  %s263_s29 = smov [#allocation8]   ;;  %v62_v2 = vld [vmem:[#allocation5] sm:$0xff]  ;;  %v56_v3 = vld [vmem:[#allocation2] sm:$0xff] }
  0x37   :  { %s86_s28 = sshll.u32 %s262_s27, 4  ;;  %s76_s30 = sshll.u32 %s263_s29, 4  ;;  %v66_v4 = vld [vmem:[#allocation7] sm:$0xff]  ;;  %s87_s28 = int_to_ptr.vmem [resolvable:$true] %s86_s28  ;;  %s331_s30 = int_to_ptr.vmem [resolvable:$true] %s76_s30 }
  0x38   :  { %v55_v1 = vand.u32 127, %v54_v0  ;;  %s264_s6 = smov [#allocation11]   ;;  %s185_s2 = scalar_lea.vmem %s87_s28, 128 }
  0x39   :  { %s96_s7 = sshll.u32 %s264_s6, 4  ;;  %p186_p10 = scmp.ne.s32.totalorder %s87_s28, %s185_s2  ;;  %s333_s7 = int_to_ptr.vmem [resolvable:$true] %s96_s7 }
  0x3a   :  { %vm57_vm0 = vcmp.lt.s32.totalorder %v55_v1, 1  ;;  %vm59_vm1 = vcmp.eq.s32.totalorder %v55_v1, 7  ;;  %p190_p11 = scmp.lt.s32.totalorder %s87_s28, %s87_s28  ;;  %p191_p12 = scmp.lt.s32.totalorder %s185_s2, %s185_s2 }
  0x3b   :  { %v63_v5 = vsel %vm57_vm0, 4294967295, %v62_v2  ;;  %v58_v6 = vsel %vm57_vm0, 0, %v56_v3  ;;  %v67_v7 = vsel %vm57_vm0, 4294967295, %v66_v4 }
  0x3c   :  { %v64_v8 = vsel %vm59_vm1, 4294967295, %v63_v5  ;;  %v60_v9 = vsel %vm59_vm1, 2, %v58_v6  ;;  %v68_v10 = vsel %vm59_vm1, 4294967295, %v67_v7  ;;  %p192_p13 = por %p191_p12, %p190_p11 }
  0x3d   :  { %65 = vst [vmem:[#allocation9] sm:$0xff] %v64_v8  ;;  %61 = vst [vmem:[#allocation8] sm:$0xff] %v60_v9 }
  0x3e   :  { %69 = vst [vmem:[#allocation11] sm:$0xff] %v68_v10  ;;  %p193_p0 = pnand %p192_p13, %p186_p10 }
  0x40   :  { %196 = shalt.err (!%p193_p0)
}
  0x41   :  { %s197_s10 = scalar_lea.hbm %s385_s4, 128 }
  0x42   :  { %p198_p1 = scmp.ne.s32.totalorder %s385_s4, %s197_s10  ;;  %p201_p2 = scmp.lt.u32.totalorder %s197_s10, %s385_s4 }
  0x44   :  { %p203_p3 = pnand %p201_p2, %p198_p1 }
  0x46   :  { %206 = shalt.err (!%p203_p3)
}
  0x47   :  { %89 = dma.vmem_to_hbm [thread:$0]  %s87_s28, 128, %s385_s4, [#allocation10]  }
  0x48   :  { %s207_s16 = scalar_lea.vmem %s331_s30, 128  ;;  %p212_p5 = scmp.lt.s32.totalorder %s331_s30, %s331_s30 }
  0x49   :  { %p208_p4 = scmp.ne.s32.totalorder %s331_s30, %s207_s16  ;;  %p213_p6 = scmp.lt.s32.totalorder %s207_s16, %s207_s16 }
  0x4b   :  { %p214_p7 = por %p213_p6, %p212_p5 }
  0x4d   :  { %p215_p8 = pnand %p214_p7, %p208_p4 }
  0x4f   :  { %218 = shalt.err (!%p215_p8)
}
  0x50   :  { %s219_s19 = scalar_lea.hbm %s384_s3, 128 }
  0x51   :  { %p220_p9 = scmp.ne.s32.totalorder %s384_s3, %s219_s19  ;;  %p223_p10 = scmp.lt.u32.totalorder %s219_s19, %s384_s3 }
  0x53   :  { %p225_p11 = pnand %p223_p10, %p220_p9 }
  0x55   :  { %228 = shalt.err (!%p225_p11)
}
  0x56   :  { %79 = dma.vmem_to_hbm [thread:$0]  %s331_s30, 128, %s384_s3, [#allocation4]  }
  0x57   :  { %s229_s26 = scalar_lea.vmem %s333_s7, 128  ;;  %p234_p13 = scmp.lt.s32.totalorder %s333_s7, %s333_s7 }
  0x58   :  { %p230_p12 = scmp.ne.s32.totalorder %s333_s7, %s229_s26  ;;  %p235_p0 = scmp.lt.s32.totalorder %s229_s26, %s229_s26 }
  0x5a   :  { %p236_p1 = por %p235_p0, %p234_p13 }
  0x5c   :  { %p237_p2 = pnand %p236_p1, %p230_p12 }
  0x5e   :  { %240 = shalt.err (!%p237_p2)
}
  0x5f   :  { %s241_s27 = scalar_lea.hbm %s386_s5, 128 }
  0x60   :  { %p242_p3 = scmp.ne.s32.totalorder %s386_s5, %s241_s27  ;;  %p245_p4 = scmp.lt.u32.totalorder %s241_s27, %s386_s5 }
  0x62   :  { %p247_p5 = pnand %p245_p4, %p242_p3 }
  0x64   :  { %250 = shalt.err (!%p247_p5)
}
  0x65   :  { %99 = dma.vmem_to_hbm [thread:$0]  %s333_s7, 128, %s386_s5, [#allocation10]  }
  0x66   :  { %255 = dma.done.wait [#allocation4], 128  }
  0x67   :  { %256 = vsyncadd [#allocation4], 4294967168 }
  0x68   :  { %257 = dma.done.wait [#allocation10], 256  }
  0x69   :  { %258 = vsyncadd [#allocation10], 4294967040 }
  0x6a   :  { %109 = vsyncpa [#allocation3], 1 }
  0x6b   :  { %110 = vsyncpa [#allocation6], 1 }
  0x6c   :  { %111 = vsyncpa [#allocation4], 1 }
  0x6d   :  { %112 = vsyncpa [#allocation10], 1 }

</bundles_post_ra>
